<compile_context>
chip_gen: v5e
topology: v5e:2x2
jax: 0.10.0
libtpu: 0.0.40
codegen_flags: <defaults>
</compile_context>

<pallas_src>
import argparse
from functools import partial

import jax
import jax.numpy as jnp
from jax import lax
from jax.experimental import pallas as pl
from jax.experimental.pallas import tpu as pltpu


_VMEM_LIMIT = 32 * 1024 * 1024          # explicit scoped-VMEM limit (v5e default is 16 MiB; v7x physical is 64 MiB)
_SMALL_ROW_BYTES = 256 * 1024           # rows below this -> per-row grid steps are overhead-bound; use take path
_LANE_TILE_BYTES = 128 * 1024           # lane-tile size for the ragged-large fallback
_ROW_BLOCK_TARGET_BYTES = 1024 * 1024   # target per-buffer size for the multi-row path


# ----------------------------------------------------------------------------
# Kernel 1: label-smoothed one-hot (replaces torch scatter_ + fill_)
# ----------------------------------------------------------------------------
def _smooth_one_hot_kernel(targets_ref, out_ref, *, on_value, off_value):
    # targets_ref: (rb, 1) int32 ; out_ref: (rb, num_classes) (tail lanes masked on store)
    rb, c = out_ref.shape
    class_ids = lax.broadcasted_iota(jnp.int32, (rb, c), 1)
    out_ref[...] = jnp.where(
        class_ids == targets_ref[...],
        jnp.float32(on_value),
        jnp.float32(off_value),
    ).astype(out_ref.dtype)


def smooth_one_hot_pallas(targets, num_classes, label_smoothing, dtype=jnp.float32):
    b = targets.shape[0]
    # num_classes == 1 guard: torch reference divides by zero here; we emit
    # off_value = 0, so the single-class row sums to 1 - label_smoothing.
    off_value = (label_smoothing / (num_classes - 1)) if num_classes > 1 else 0.0
    on_value = 1.0 - label_smoothing
    t2d = targets.reshape(b, 1).astype(jnp.int32)

    # Grid over the batch so the kernel pipelines and scales to large B*C
    # (and v7x can split the batch across its 2 TensorCores).
    cp = ((num_classes + 127) // 128) * 128                      # internal lane padding only
    rows = max(8, ((2 * 1024 * 1024) // (cp * 4)) // 8 * 8)      # ~2 MiB per output buffer
    rb = b if b <= rows else rows
    grid = (pl.cdiv(b, rb),)

    kernel = partial(_smooth_one_hot_kernel, on_value=on_value, off_value=off_value)
    out = pl.pallas_call(
        kernel,
        out_shape=jax.ShapeDtypeStruct((b, num_classes), dtype),
        grid=grid,
        in_specs=[pl.BlockSpec((rb, 1), lambda i: (i, 0))],
        # minor block dim == full num_classes -> exempt from the 128 rule
        # (masked tail store); no padded columns ever reach HBM, no post slice.
        out_specs=pl.BlockSpec((rb, num_classes), lambda i: (i, 0)),
        compiler_params=pltpu.CompilerParams(
            dimension_semantics=("parallel",),
            vmem_limit_bytes=_VMEM_LIMIT,
        ),
    )(t2d)
    # TODO(synk): fuse this into the downstream loss kernel so the one-hot never
    # hits HBM; loss_fn is abstract in the reference module.
    return out


# ----------------------------------------------------------------------------
# Kernel 2: mixup input blending  out = lam * x + (1 - lam) * x[perm]
# ----------------------------------------------------------------------------
def _mixup_blend_body(lam_ref, x_ref, xperm_ref, out_ref):
    # lam_ref: SMEM (1,) float32 ; x/xperm/out: tiles in the native input dtype
    lam = lam_ref[0]
    xa = x_ref[...].astype(jnp.float32)
    xb = xperm_ref[...].astype(jnp.float32)
    out_ref[...] = (lam * xa + (1.0 - lam) * xb).astype(out_ref.dtype)


def _mixup_blend_gather_kernel(perm_ref, lam_ref, x_ref, xperm_ref, out_ref):
    del perm_ref  # only used by the index_maps
    _mixup_blend_body(lam_ref, x_ref, xperm_ref, out_ref)


def _mixup_blend_gather(x3d, perm, lam_arr, out_dtype, dtype_bytes):
    """Large lane-aligned rows: permutation folded into the x[perm] index_map."""
    b, s, _ = x3d.shape
    max_bs = 1024 if dtype_bytes >= 4 else 2048   # <= 512 KiB per buffer
    bs = s if s <= max_bs else max_bs
    nj = pl.cdiv(s, bs)

    # Put the larger parallel extent first so both v7x TensorCores get work.
    if b >= nj:
        grid = (b, nj)
        xmap = lambda i, j, perm: (i, j, 0)
        pmap = lambda i, j, perm: (perm[i], j, 0)
    else:
        grid = (nj, b)
        xmap = lambda j, i, perm: (i, j, 0)
        pmap = lambda j, i, perm: (perm[i], j, 0)

    n_elems = b * s * 128
    return pl.pallas_call(
        _mixup_blend_gather_kernel,
        out_shape=jax.ShapeDtypeStruct((b, s, 128), out_dtype),
        grid_spec=pltpu.PrefetchScalarGridSpec(
            num_scalar_prefetch=1,   # rand_index -> SMEM, visible to index_maps
            grid=grid,
            in_specs=[
                # lam: whole (1,) array resident in SMEM
                pl.BlockSpec(memory_space=pltpu.MemorySpace.SMEM),
                # x[i] tile
                pl.BlockSpec((1, bs, 128), xmap),
                # x[perm[i]] tile: gathered via the scalar-prefetched index, no
                # permuted copy in HBM; 3-deep buffering hides the random-row
                # DMA issue latency (matters most on v7x's faster HBM).
                pl.BlockSpec((1, bs, 128), pmap, pipeline_mode=pl.Buffered(3)),
            ],
            out_specs=pl.BlockSpec((1, bs, 128), xmap),
        ),
        compiler_params=pltpu.CompilerParams(
            dimension_semantics=("parallel", "parallel"),
            vmem_limit_bytes=_VMEM_LIMIT,
        ),
        cost_estimate=pl.CostEstimate(
            flops=3 * n_elems, transcendentals=0,
            bytes_accessed=3 * n_elems * dtype_bytes),
    )(perm, lam_arr, x3d, x3d)


def _mixup_blend_take(x2d, perm, lam_arr, out_dtype, dtype_bytes):
    """Small or ragged rows: x[perm] materialized once, multi-row 2-D blocks."""
    b, feat = x2d.shape
    xp2d = jnp.take(x2d, perm, axis=0)   # one extra HBM pass; far cheaper than
                                         # per-row grid steps or pad/slice passes.

    if feat * dtype_bytes <= _SMALL_ROW_BYTES:
        lb = feat                                               # full array dim: exempt from the 128 rule
    else:
        lb = max(128, (_LANE_TILE_BYTES // dtype_bytes) // 128 * 128)
    lb_padded = ((lb + 127) // 128) * 128
    rows = max(8, (_ROW_BLOCK_TARGET_BYTES // (lb_padded * dtype_bytes)) // 8 * 8)
    rb = b if b <= rows else rows

    ni = pl.cdiv(b, rb)
    nj = pl.cdiv(feat, lb)

    # Larger parallel extent first (v7x dual TensorCore).
    if ni >= nj:
        grid = (ni, nj)
        imap = lambda i, j: (i, j)
    else:
        grid = (nj, ni)
        imap = lambda j, i: (i, j)

    n_elems = b * feat
    return pl.pallas_call(
        _mixup_blend_body,
        out_shape=jax.ShapeDtypeStruct((b, feat), out_dtype),
        grid=grid,
        in_specs=[
            pl.BlockSpec(memory_space=pltpu.MemorySpace.SMEM),   # lam
            pl.BlockSpec((rb, lb), imap),
            pl.BlockSpec((rb, lb), imap),
        ],
        out_specs=pl.BlockSpec((rb, lb), imap),
        compiler_params=pltpu.CompilerParams(
            dimension_semantics=("parallel", "parallel"),
            vmem_limit_bytes=_VMEM_LIMIT,
        ),
        cost_estimate=pl.CostEstimate(
            flops=3 * n_elems, transcendentals=0,
            bytes_accessed=3 * n_elems * dtype_bytes),
    )(lam_arr, x2d, xp2d)


def mixup_blend_pallas(x, rand_index, lam):
    """lam * x + (1 - lam) * x[rand_index], preserving x's dtype and shape."""
    orig_shape = x.shape
    orig_dtype = x.dtype
    b = x.shape[0]
    feat = 1
    for d in x.shape[1:]:
        feat *= int(d)
    dtype_bytes = jnp.dtype(orig_dtype).itemsize

    lam_arr = jnp.asarray(lam, jnp.float32).reshape(1)
    perm = jnp.asarray(rand_index, jnp.int32)

    row_bytes = feat * dtype_bytes
    if row_bytes > _SMALL_ROW_BYTES and feat % 128 == 0:
        # Large, lane-aligned rows: per-row gather path (no x[perm] copy, ~3
        # HBM passes total). Reshape is a layout-preserving split of the
        # trailing dim -> no extra HBM pass.
        x3d = x.reshape(b, feat // 128, 128)
        out3d = _mixup_blend_gather(x3d, perm, lam_arr, orig_dtype, dtype_bytes)
        return out3d.reshape(orig_shape)

    # Small rows or ragged feature counts: multi-row blocked take path; ragged
    # lane tail handled inside the kernel (no pad / no post-slice).
    x2d = x.reshape(b, feat)
    out2d = _mixup_blend_take(x2d, perm, lam_arr, orig_dtype, dtype_bytes)
    return out2d.reshape(orig_shape)


# ----------------------------------------------------------------------------
# JAX port of the _Loss base class
# ----------------------------------------------------------------------------
class LossJax:
    def __init__(self, args, num_classes, reduction="mean"):
        self.reduction = reduction
        self.augmentation = (
            None
            if args.augmentation not in ["mixup", "cutmix"]
            else getattr(self, args.augmentation)
        )
        assert 0 <= args.label_smoothing < 1
        self.label_smoothing = args.label_smoothing
        self.num_classes = num_classes
        self.beta = args.beta
        self.cutmix_prob = args.cutmix_prob

    def smooth_one_hot(self, targets):
        return smooth_one_hot_pallas(targets, self.num_classes, self.label_smoothing)

    def mixup(self, input_, one_hot_targets, model, key):
        # Randomness is made deterministic via an explicit PRNG key.
        k_lam, k_perm = jax.random.split(key)
        lam = jax.random.beta(k_lam, self.beta, self.beta)
        rand_index = jax.random.permutation(k_perm, input_.shape[0])
        target_a = one_hot_targets
        target_b = jnp.take(one_hot_targets, rand_index, axis=0)  # tiny glue gather
        mixed_input_ = mixup_blend_pallas(input_, rand_index, lam)
        # TODO(synk): model(mixed_input_) and self.loss_fn(...) are abstract in
        # the reference module; return the blended inputs / targets instead.
        return mixed_input_, target_a, target_b, lam

    def cutmix(self, input_, one_hot_targets, model, key):
        # TODO(synk): relies on the external `rand_bbox` helper and the
        # abstract loss_fn/model; no concrete compute to port beyond mixup.
        raise NotImplementedError

    def loss_fn(self, logits, one_hot_targets):
        raise NotImplementedError  # abstract in the reference module

    def forward(self, logits, targets, model):
        raise NotImplementedError  # abstract in the reference module


# ----------------------------------------------------------------------------
# Demo / smoke test
# ----------------------------------------------------------------------------
if __name__ == "__main__":
    args = argparse.Namespace(
        augmentation="mixup",
        label_smoothing=0.1,
        beta=1.0,
        cutmix_prob=0.5,
    )
    num_classes = 10
    batch, channels, spatial = 2, 4, 16

    loss_mod = LossJax(args, num_classes=num_classes, reduction="mean")

    key = jax.random.PRNGKey(0)
    k_x, k_t, k_aug, k_perm = jax.random.split(key, 4)
    x = jax.random.normal(k_x, (batch, channels, spatial, spatial), jnp.float32)  # NCHW
    targets = jax.random.randint(k_t, (batch,), 0, num_classes, jnp.int32)

    # 1) label-smoothed one-hot (gridded over batch, direct (B, C) output)
    one_hot = jax.block_until_ready(loss_mod.smooth_one_hot(targets))
    ref = jnp.full(
        (batch, num_classes), args.label_smoothing / (num_classes - 1), jnp.float32
    )
    ref = ref.at[jnp.arange(batch), targets].set(1.0 - args.label_smoothing)
    assert one_hot.shape == (batch, num_classes)
    assert jnp.allclose(one_hot, ref, atol=1e-6), "smooth_one_hot mismatch"

    # 2) mixup blend -- small-feature path (x[perm] materialized, multi-row blocks)
    lam = jnp.float32(0.3)
    perm = jax.random.permutation(k_perm, batch)
    mixed = jax.block_until_ready(mixup_blend_pallas(x, perm, lam))
    ref_mix = lam * x + (1.0 - lam) * x[perm]
    assert mixed.shape == x.shape and mixed.dtype == x.dtype
    assert jnp.allclose(mixed, ref_mix, atol=1e-6), "mixup blend mismatch (f32)"

    # 2b) native-dtype path: bf16 in -> bf16 out (blend done in f32 in-kernel)
    x_bf16 = x.astype(jnp.bfloat16)
    mixed_bf = jax.block_until_ready(mixup_blend_pallas(x_bf16, perm, lam))
    assert mixed_bf.dtype == jnp.bfloat16
    ref_bf = (lam * x_bf16.astype(jnp.float32)
              + (1.0 - lam) * x_bf16.astype(jnp.float32)[perm])
    assert jnp.allclose(mixed_bf.astype(jnp.float32), ref_bf, atol=1e-2), \
        "mixup blend mismatch (bf16)"

    # 2c) ragged feature count (4*15*15 = 900): handled in-kernel, no pad/slice
    x_odd = jax.random.normal(k_x, (batch, channels, 15, 15), jnp.float32)
    mixed_odd = jax.block_until_ready(mixup_blend_pallas(x_odd, perm, lam))
    ref_odd = lam * x_odd + (1.0 - lam) * x_odd[perm]
    assert jnp.allclose(mixed_odd, ref_odd, atol=1e-6), "mixup blend mismatch (ragged)"

    # 2d) large lane-aligned rows -> per-row gather path (perm folded into index_map)
    x_big = jax.random.normal(k_x, (batch, 1, 512, 512), jnp.float32)   # feat = 262144
    mixed_big = jax.block_until_ready(mixup_blend_pallas(x_big, perm, lam))
    ref_big = lam * x_big + (1.0 - lam) * x_big[perm]
    assert jnp.allclose(mixed_big, ref_big, atol=1e-6), "mixup blend mismatch (gather)"

    # 2e) large ragged rows -> tiled take path (boundary lane block masked)
    x_rag = jax.random.normal(k_x, (batch, 140000), jnp.float32)        # 140000 % 128 != 0
    mixed_rag = jax.block_until_ready(mixup_blend_pallas(x_rag, perm, lam))
    ref_rag = lam * x_rag + (1.0 - lam) * x_rag[perm]
    assert jnp.allclose(mixed_rag, ref_rag, atol=1e-6), "mixup blend mismatch (large ragged)"

    # 3) full module-level mixup flow (random lam / permutation from the key)
    mixed2, tgt_a, tgt_b, lam2 = loss_mod.mixup(x, one_hot, model=None, key=k_aug)
    mixed2 = jax.block_until_ready(mixed2)
    assert mixed2.shape == x.shape and mixed2.dtype == x.dtype
    assert tgt_a.shape == (batch, num_classes) and tgt_b.shape == (batch, num_classes)

    print("KERNEL_OK")
</pallas_src>

<mosaic_0001>
module attributes {stable_mosaic.version = 11 : i64} {
  func.func @_smooth_one_hot_kernel(%arg0: i32, %arg1: memref<2x1xi32, #tpu.memory_space<vmem>>, %arg2: memref<2x10xf32, #tpu.memory_space<vmem>>) attributes {dimension_semantics = [#tpu.dimension_semantics<parallel>], iteration_bounds = array<i64: 1>, scalar_prefetch = 0 : i64, scratch_operands = 0 : i64, tpu.core_type = #tpu.core_type<tc>, window_params = [{transform_indices = @transform_0, window_bounds = array<i64: 2, 1>}, {transform_indices = @transform_1, window_bounds = array<i64: 2, 10>}]} {
    %0 = tpu.iota {dimensions = array<i32: 1>} : vector<2x10xi32>
    %c0 = arith.constant 0 : index
    %c0_0 = arith.constant 0 : index
    %1 = vector.load %arg1[%c0, %c0_0] : memref<2x1xi32, #tpu.memory_space<vmem>>, vector<2x1xi32>
    %2 = vector.broadcast %1 : vector<2x1xi32> to vector<2x10xi32>
    %3 = arith.cmpi eq, %0, %2 : vector<2x10xi32>
    %cst = arith.constant 0.899999976 : f32
    %cst_1 = arith.constant 0.0111111114 : f32
    %4 = vector.broadcast %cst : f32 to vector<2x10xf32>
    %5 = vector.broadcast %cst_1 : f32 to vector<2x10xf32>
    %6 = arith.select %3, %4, %5 : vector<2x10xi1>, vector<2x10xf32>
    %c0_2 = arith.constant 0 : index
    %c0_3 = arith.constant 0 : index
    %7 = vector.load %arg2[%c0_2, %c0_3] : memref<2x10xf32, #tpu.memory_space<vmem>>, vector<2x10xf32>
    tpu.vector_store %arg2[%c0_2, %c0_3], %6 {strides = array<i32>} : memref<2x10xf32, #tpu.memory_space<vmem>>, vector<2x10xf32>,
    return
  }
  func.func @transform_0(%arg0: i32) -> (i32, i32) {
    %c0_i32 = arith.constant 0 : i32
    %c0_i32_0 = arith.constant 0 : i32
    return %arg0, %c0_i32 : i32, i32
  }
  func.func @transform_1(%arg0: i32) -> (i32, i32) {
    %c0_i32 = arith.constant 0 : i32
    %c0_i32_0 = arith.constant 0 : i32
    return %arg0, %c0_i32 : i32, i32
  }
}

</mosaic_0001>

<bundles_post_ra>
// kernel: tpu_custom_call.1
= control target key start
LH: loop header
LB: loop body
LE: loop exit
PB: predicated region body
PF: predicated region fallthrough
CT: control target
= control target key end

     0   :  { %v65_v1 = vmov 0   ;;  %s84_s0 = inlined_call_operand.vmem [shape: s32[2,1], index: 0, kind: input, shape index: {}]   ;;  %s85_s1 = inlined_call_operand.hbm [shape: f32[2,10], index: 1, kind: output, shape index: {}]  }
   0x1   :  { %v11_v0 = vld [vmem:[%s84_s0] sm:$0x3]  ;;  %38 = vset.pattern.permute.xlu0 %v65_v1 }
   0x2   :  { %6 = vsyncpa [#allocation3], 0  ;;  %13 = vperm.xlu0 %38, %v11_v0   ;;  %v9_v2 = vlaneseq  ;;  %s66_s8 = smov [#allocation2]   ;;  %s26_s12 = sshll.u32 %s85_s1, 4  ;;  %vm17_vm0 = vcmask 74752   ;;  %s27_s12 = int_to_ptr.hbm [resolvable:$true] %s26_s12 }
   0x3   :  { %s24_s9 = sshll.u32 %s66_s8, 4  ;;  %v67_v5 = vmov 0.011111111   ;;  %s25_s9 = int_to_ptr.vmem [resolvable:$true] %s24_s9 }
   0x4   :  { %v10_v3 = vand.u32 127, %v9_v2 }
  0x74   :  { %v14_v4 = vpop.permute.xlu0 %13 }
  0x75   :  { %vm15_vm1 = vcmp.eq.s32.totalorder %v10_v3, %v14_v4 }
  0x76   :  { %v16_v6 = vsel %vm15_vm1, 0.9, %v67_v5 }
  0x77   :  { %18 = vst.msk [vmem:[#allocation2] sm:$0x3] %vm17_vm0, %v16_v6 }
  0x78   :  { %29 = dma.vmem_to_hbm [thread:$0]  %s25_s9, 32, %s27_s12, [#allocation3]  }
  0x79   :  { %63 = dma.done.wait [#allocation3], 32  }
  0x7a   :  { %64 = vsyncadd [#allocation3], 4294967264 }
  0x7b   :  { %34 = vsyncpa [#allocation3], 1 }

</bundles_post_ra>
